<compile_context>
chip_gen: v5e
topology: v5e:2x2
jax: 0.10.0
libtpu: 0.0.40
codegen_flags: <defaults>
</compile_context>

<pallas_src>
import functools

import jax
import jax.numpy as jnp
from jax.experimental import pallas as pl
from jax.experimental.pallas import tpu as pltpu


def _linear_comb_kernel(cls_ref, tok_ref, wt_ref, b_ref, o_ref, acc_ref, *,
                        n_valid):
    # cls_ref: (TB, 1, D)  cls tokens, input precision (f32 here)
    # tok_ref: (TB, TN, D) one N-chunk of tokens (bf16 MXU operand)
    # wt_ref : (D, D)      W^T (bf16), so y = x @ wt + bias
    # b_ref  : (1, D)      bias (f32)
    # o_ref  : (TB, 1, D)  output block
    # acc_ref: (TB, 1, D)  f32 weighted-sum accumulator (lives across N-chunks)
    n = pl.program_id(1)
    tb, tn, d = tok_ref.shape

    @pl.when(n == 0)
    def _init():
        acc_ref[...] = jnp.zeros_like(acc_ref)

    # Projection of this N-chunk on the MXU (bf16 x bf16 -> f32 accumulate).
    x = tok_ref[...]
    p = jnp.dot(x.reshape(tb * tn, d), wt_ref[...],
                preferred_element_type=jnp.float32)
    p = p.reshape(tb, tn, d) + b_ref[...]                        # (TB, TN, D) f32

    cls = cls_ref[...].astype(jnp.float32)                       # (TB, 1, D)

    # Coefficients c = <p_row, cls>: VPU multiply + lane reduction (XLU);
    # the MXU stays reserved for the projection.
    c = jnp.sum(p * cls, axis=-1, keepdims=True)                 # (TB, TN, 1)

    # Zero the cls row (global row 0) and zero-padded rows (>= n_valid).
    row = n * tn + jax.lax.broadcasted_iota(jnp.int32, (tb, tn, 1), 1)
    c = jnp.where((row == 0) | (row >= n_valid), 0.0, c)

    acc_ref[...] += jnp.sum(c * p, axis=1, keepdims=True)        # (TB, 1, D)

    @pl.when(n == pl.num_programs(1) - 1)
    def _finalize():
        o_ref[...] = (cls + acc_ref[...]).astype(o_ref.dtype)


def linear_comb(tokens, weight, bias, *, mxu_dtype=jnp.bfloat16):
    """tokens: (B, N, D); weight: (D, D) [nn.Linear layout, out x in]; bias: (D,)."""
    B, N, D = tokens.shape
    out_dtype = tokens.dtype
    MiB = 1024 * 1024

    # cls stays at input precision (exact residual + f32 coefficient reduce).
    cls = tokens[:, 0, :].reshape(B, 1, D)

    # ---- generation-aware VMEM sizing --------------------------------------
    try:
        vmem_cap = int(pltpu.get_tpu_info().vmem_capacity_bytes)
    except Exception:
        vmem_cap = 64 * MiB                      # conservative: v7x per-TC VMEM
    # Headroom for Mosaic internal scratch / spills: ~56 MiB on v7x,
    # ~110 MiB on v5e/v6e (128 MiB physical).
    vmem_limit = int(min(vmem_cap - 8 * MiB, 110 * MiB))
    budget = int(vmem_limit * 0.6)               # what our sized buffers target

    mxu_bytes = jnp.dtype(mxu_dtype).itemsize
    io_bytes = jnp.dtype(out_dtype).itemsize

    # N-chunk: stream the projection so only (TB, TN, D) of f32 p is live.
    n_pad = -(-N // 8) * 8
    tn = 8
    for cand in range(8, min(n_pad, 128) + 1, 8):
        if n_pad % cand == 0:
            tn = cand

    # VMEM accounting (count everything, not just the token slab):
    #   fixed : W^T (ideally single-buffered) + bias
    #   /row  : 2x token chunk (bf16) + 2x cls + 2x out + f32 acc
    #           + in-kernel f32 temporaries (~2 chunk-sized passes: p, c*p).
    fixed = D * D * mxu_bytes + D * 4
    per_row = (2 * tn * D * mxu_bytes + 2 * D * io_bytes + 2 * D * io_bytes
               + D * 4 + 2 * tn * D * 4 + tn * 4)
    tb = max(1, (budget - fixed) // per_row)
    # >= 2 steps on the "parallel" batch axis so both v7x TensorCores get work.
    tb = int(min(tb, max(1, -(-B // 2)), B))
    # Prefer a tb dividing B (avoids a batch-padding pass over HBM).
    div = max((k for k in range(1, tb + 1) if B % k == 0), default=1)
    if 2 * div >= tb:
        tb = div
    b_pad = -(-B // tb) * tb

    # ---- operand prep (skip HBM copies when already aligned) ----------------
    tok = tokens.astype(mxu_dtype)
    if (b_pad, n_pad) != (B, N):
        tok = jnp.pad(tok, ((0, b_pad - B), (0, n_pad - N), (0, 0)))
    cls_in = cls if b_pad == B else jnp.pad(cls, ((0, b_pad - B), (0, 0), (0, 0)))
    wt = weight.T.astype(mxu_dtype)              # pre-transpose once: y = x @ W^T
    b2 = bias.reshape(1, D).astype(jnp.float32)

    kernel = functools.partial(_linear_comb_kernel, n_valid=N)

    def _call(single_buffer_consts):
        # Constant-index operands are only fetched once; Buffered(1) reclaims
        # the wasted second pipeline buffer when this JAX build supports it.
        const_kwargs = (dict(pipeline_mode=pl.Buffered(1))
                        if single_buffer_consts else {})
        grid_spec = pltpu.PrefetchScalarGridSpec(
            num_scalar_prefetch=0,
            grid=(b_pad // tb, n_pad // tn),
            in_specs=[
                pl.BlockSpec((tb, 1, D), lambda b, n: (b, 0, 0)),    # cls (f32)
                pl.BlockSpec((tb, tn, D), lambda b, n: (b, n, 0)),   # tokens (bf16)
                pl.BlockSpec((D, D), lambda b, n: (0, 0),
                             **const_kwargs),                        # W^T (shared)
                pl.BlockSpec((1, D), lambda b, n: (0, 0),
                             **const_kwargs),                        # bias (shared)
            ],
            out_specs=pl.BlockSpec((tb, 1, D), lambda b, n: (b, 0, 0)),
            scratch_shapes=[pltpu.VMEM((tb, 1, D), jnp.float32)],
        )
        res = pl.pallas_call(
            kernel,
            out_shape=jax.ShapeDtypeStruct((b_pad, 1, D), out_dtype),
            grid_spec=grid_spec,
            compiler_params=pltpu.CompilerParams(
                dimension_semantics=("parallel", "arbitrary"),
                vmem_limit_bytes=vmem_limit),
        )(cls_in, tok, wt, b2)
        return jax.block_until_ready(res)

    try:
        out = _call(True)
    except Exception:
        # pipeline_mode / Buffered(1) unsupported in this build: fall back to
        # default double-buffering of the (small) constant operands.
        out = _call(False)

    return out[:B, 0, :]


def _reference(tokens, weight, bias):
    """Pure-JAX reference of Linear_comb.forward (f32 math)."""
    hi = jax.lax.Precision.HIGHEST
    cls = tokens[:, 0, :].astype(jnp.float32)
    x = tokens[:, 1:, :].astype(jnp.float32)
    w = weight.astype(jnp.float32)
    b = bias.astype(jnp.float32)
    p = jnp.einsum("bsd,od->bso", x, w, precision=hi) + b        # (B, S, D)
    c = jnp.einsum("bsd,bd->bs", p, cls, precision=hi)           # (B, S)
    return cls + jnp.einsum("bs,bsd->bd", c, p, precision=hi)    # (B, D)


if __name__ == "__main__":
    key = jax.random.PRNGKey(0)
    k1, k2, k3 = jax.random.split(key, 3)

    B, S, D = 2, 8, 32          # embed_dim = 32, seq = 1 (cls) + 8 patches
    N = S + 1

    tokens = jax.random.normal(k1, (B, N, D), dtype=jnp.float32)
    # Deterministic parameters (nn.Linear shapes: W (D, D), b (D,))
    weight = jax.random.normal(k2, (D, D), dtype=jnp.float32) * 0.05
    bias = jax.random.normal(k3, (D,), dtype=jnp.float32) * 0.01

    out = linear_comb(tokens, weight, bias)
    out = jax.block_until_ready(out)
    assert out.shape == (B, D)

    # Reference evaluated on the same bf16-quantized MXU operands (tokens /
    # weight); cls and bias stay f32 in both, so any remaining difference is
    # just summation order.
    tok_q = tokens.astype(jnp.bfloat16).astype(jnp.float32)
    tok_q = tok_q.at[:, 0, :].set(tokens[:, 0, :])   # kernel keeps cls in f32
    w_q = weight.astype(jnp.bfloat16).astype(jnp.float32)
    ref = _reference(tok_q, w_q, bias)

    max_diff = jnp.max(jnp.abs(out - ref))
    assert jnp.allclose(out, ref, atol=2e-3, rtol=2e-3), (
        f"max abs diff {max_diff}")

    print("KERNEL_OK")
</pallas_src>

<mosaic_0001>
module attributes {stable_mosaic.version = 11 : i64} {
  func.func @_linear_comb_kernel(%arg0: i32, %arg1: i32, %arg2: memref<1x1x32xf32, #tpu.memory_space<vmem>>, %arg3: memref<1x16x32xbf16, #tpu.memory_space<vmem>>, %arg4: memref<32x32xbf16, #tpu.memory_space<vmem>>, %arg5: memref<1x32xf32, #tpu.memory_space<vmem>>, %arg6: memref<1x1x32xf32, #tpu.memory_space<vmem>>, %arg7: memref<1x1x32xf32, #tpu.memory_space<vmem>>) attributes {dimension_semantics = [#tpu.dimension_semantics<parallel>, #tpu.dimension_semantics<arbitrary>], iteration_bounds = array<i64: 2, 1>, scalar_prefetch = 0 : i64, scratch_operands = 1 : i64, tpu.core_type = #tpu.core_type<tc>, window_params = [{transform_indices = @transform_0, window_bounds = array<i64: 1, 1, 32>}, {transform_indices = @transform_1, window_bounds = array<i64: 1, 16, 32>}, {pipeline_mode = #tpu.pipeline_mode<synchronous>, transform_indices = @transform_2, window_bounds = array<i64: 32, 32>}, {pipeline_mode = #tpu.pipeline_mode<synchronous>, transform_indices = @transform_3, window_bounds = array<i64: 1, 32>}, {transform_indices = @transform_4, window_bounds = array<i64: 1, 1, 32>}]} {
    %c0_i32 = arith.constant 0 : i32
    %0 = arith.cmpi eq, %arg1, %c0_i32 : i32
    %1 = arith.extui %0 : i1 to i32
    %c0_i32_0 = arith.constant 0 : i32
    %2 = arith.cmpi ne, %1, %c0_i32_0 : i32
    scf.if %2 {
      %cst_22 = arith.constant 0.000000e+00 : f32
      %38 = vector.broadcast %cst_22 : f32 to vector<1x1x32xf32>
      %c0_23 = arith.constant 0 : index
      %c0_24 = arith.constant 0 : index
      %c0_25 = arith.constant 0 : index
      %39 = vector.load %arg7[%c0_23, %c0_24, %c0_25] : memref<1x1x32xf32, #tpu.memory_space<vmem>>, vector<1x1x32xf32>
      tpu.vector_store %arg7[%c0_23, %c0_24, %c0_25], %38 {strides = array<i32>} : memref<1x1x32xf32, #tpu.memory_space<vmem>>, vector<1x1x32xf32>,
    } else {
    }
    %c0 = arith.constant 0 : index
    %c0_1 = arith.constant 0 : index
    %c0_2 = arith.constant 0 : index
    %3 = vector.load %arg3[%c0, %c0_1, %c0_2] : memref<1x16x32xbf16, #tpu.memory_space<vmem>>, vector<1x16x32xbf16>
    %4 = vector.shape_cast %3 : vector<1x16x32xbf16> to vector<16x32xbf16>
    %c0_3 = arith.constant 0 : index
    %c0_4 = arith.constant 0 : index
    %5 = vector.load %arg4[%c0_3, %c0_4] : memref<32x32xbf16, #tpu.memory_space<vmem>>, vector<32x32xbf16>
    %cst = arith.constant dense<0.000000e+00> : vector<16x32xf32>
    %6 = tpu.matmul %4, %5, %cst {dimension_numbers = #tpu.dot_dimension_numbers<[1], [0], [0], [1], [0, 0, 1, 1], [], []>} : vector<16x32xbf16>, vector<32x32xbf16>, vector<16x32xf32> -> vector<16x32xf32>
    %7 = vector.shape_cast %6 : vector<16x32xf32> to vector<1x16x32xf32>
    %c0_5 = arith.constant 0 : index
    %c0_6 = arith.constant 0 : index
    %8 = vector.load %arg5[%c0_5, %c0_6] : memref<1x32xf32, #tpu.memory_space<vmem>>, vector<1x32xf32>
    %9 = vector.shape_cast %8 : vector<1x32xf32> to vector<1x1x32xf32>
    %10 = vector.broadcast %9 : vector<1x1x32xf32> to vector<1x16x32xf32>
    %11 = arith.addf %7, %10 : vector<1x16x32xf32>
    %c0_7 = arith.constant 0 : index
    %c0_8 = arith.constant 0 : index
    %c0_9 = arith.constant 0 : index
    %12 = vector.load %arg2[%c0_7, %c0_8, %c0_9] : memref<1x1x32xf32, #tpu.memory_space<vmem>>, vector<1x1x32xf32>
    %13 = vector.broadcast %12 : vector<1x1x32xf32> to vector<1x16x32xf32>
    %14 = arith.mulf %11, %13 : vector<1x16x32xf32>
    %cst_10 = arith.constant dense<0.000000e+00> : vector<1x16xf32>
    %15 = vector.multi_reduction <add>, %14, %cst_10 [2] : vector<1x16x32xf32> to vector<1x16xf32>
    %16 = vector.shape_cast %15 : vector<1x16xf32> to vector<1x16x1xf32>
    %c16_i32 = arith.constant 16 : i32
    %17 = arith.muli %arg1, %c16_i32 : i32
    %18 = tpu.iota {dimensions = array<i32: 1>} : vector<1x16x1xi32>
    %19 = vector.broadcast %17 : i32 to vector<1x16x1xi32>
    %20 = arith.addi %19, %18 : vector<1x16x1xi32>
    %c0_i32_11 = arith.constant 0 : i32
    %21 = vector.broadcast %c0_i32_11 : i32 to vector<1x16x1xi32>
    %22 = arith.cmpi eq, %20, %21 : vector<1x16x1xi32>
    %c9_i32 = arith.constant 9 : i32
    %23 = vector.broadcast %c9_i32 : i32 to vector<1x16x1xi32>
    %24 = arith.cmpi sge, %20, %23 : vector<1x16x1xi32>
    %25 = arith.ori %22, %24 : vector<1x16x1xi1>
    %cst_12 = arith.constant 0.000000e+00 : f32
    %26 = vector.broadcast %cst_12 : f32 to vector<1x16x1xf32>
    %27 = arith.select %25, %26, %16 : vector<1x16x1xi1>, vector<1x16x1xf32>
    %c0_13 = arith.constant 0 : index
    %c0_14 = arith.constant 0 : index
    %c0_15 = arith.constant 0 : index
    %28 = vector.load %arg7[%c0_13, %c0_14, %c0_15] : memref<1x1x32xf32, #tpu.memory_space<vmem>>, vector<1x1x32xf32>
    %29 = vector.broadcast %27 : vector<1x16x1xf32> to vector<1x16x32xf32>
    %30 = arith.mulf %29, %11 : vector<1x16x32xf32>
    %cst_16 = arith.constant dense<0.000000e+00> : vector<1x32xf32>
    %31 = vector.multi_reduction <add>, %30, %cst_16 [1] : vector<1x16x32xf32> to vector<1x32xf32>
    %32 = vector.shape_cast %31 : vector<1x32xf32> to vector<1x1x32xf32>
    %33 = arith.addf %28, %32 : vector<1x1x32xf32>
    %c0_17 = arith.constant 0 : index
    %c0_18 = arith.constant 0 : index
    %c0_19 = arith.constant 0 : index
    %34 = vector.load %arg7[%c0_17, %c0_18, %c0_19] : memref<1x1x32xf32, #tpu.memory_space<vmem>>, vector<1x1x32xf32>
    tpu.vector_store %arg7[%c0_17, %c0_18, %c0_19], %33 {strides = array<i32>} : memref<1x1x32xf32, #tpu.memory_space<vmem>>, vector<1x1x32xf32>,
    %c0_i32_20 = arith.constant 0 : i32
    %35 = arith.cmpi eq, %arg1, %c0_i32_20 : i32
    %36 = arith.extui %35 : i1 to i32
    %c0_i32_21 = arith.constant 0 : i32
    %37 = arith.cmpi ne, %36, %c0_i32_21 : i32
    scf.if %37 {
      %c0_22 = arith.constant 0 : index
      %c0_23 = arith.constant 0 : index
      %c0_24 = arith.constant 0 : index
      %38 = vector.load %arg7[%c0_22, %c0_23, %c0_24] : memref<1x1x32xf32, #tpu.memory_space<vmem>>, vector<1x1x32xf32>
      %39 = arith.addf %12, %38 : vector<1x1x32xf32>
      %c0_25 = arith.constant 0 : index
      %c0_26 = arith.constant 0 : index
      %c0_27 = arith.constant 0 : index
      %40 = vector.load %arg6[%c0_25, %c0_26, %c0_27] : memref<1x1x32xf32, #tpu.memory_space<vmem>>, vector<1x1x32xf32>
      tpu.vector_store %arg6[%c0_25, %c0_26, %c0_27], %39 {strides = array<i32>} : memref<1x1x32xf32, #tpu.memory_space<vmem>>, vector<1x1x32xf32>,
    } else {
    }
    return
  }
  func.func @transform_0(%arg0: i32, %arg1: i32) -> (i32, i32, i32) {
    %c0_i32 = arith.constant 0 : i32
    %c0_i32_0 = arith.constant 0 : i32
    %c0_i32_1 = arith.constant 0 : i32
    return %arg0, %c0_i32, %c0_i32_0 : i32, i32, i32
  }
  func.func @transform_1(%arg0: i32, %arg1: i32) -> (i32, i32, i32) {
    %c0_i32 = arith.constant 0 : i32
    %c0_i32_0 = arith.constant 0 : i32
    return %arg0, %arg1, %c0_i32 : i32, i32, i32
  }
  func.func @transform_2(%arg0: i32, %arg1: i32) -> (i32, i32) {
    %c0_i32 = arith.constant 0 : i32
    %c0_i32_0 = arith.constant 0 : i32
    %c0_i32_1 = arith.constant 0 : i32
    return %c0_i32, %c0_i32_0 : i32, i32
  }
  func.func @transform_3(%arg0: i32, %arg1: i32) -> (i32, i32) {
    %c0_i32 = arith.constant 0 : i32
    %c0_i32_0 = arith.constant 0 : i32
    %c0_i32_1 = arith.constant 0 : i32
    return %c0_i32, %c0_i32_0 : i32, i32
  }
  func.func @transform_4(%arg0: i32, %arg1: i32) -> (i32, i32, i32) {
    %c0_i32 = arith.constant 0 : i32
    %c0_i32_0 = arith.constant 0 : i32
    %c0_i32_1 = arith.constant 0 : i32
    return %arg0, %c0_i32, %c0_i32_0 : i32, i32, i32
  }
}

module attributes {stable_mosaic.version = 11 : i64} {
  func.func @_linear_comb_kernel(%arg0: i32, %arg1: i32, %arg2: memref<1x1x32xf32, #tpu.memory_space<vmem>>, %arg3: memref<1x16x32xbf16, #tpu.memory_space<vmem>>, %arg4: memref<32x32xbf16, #tpu.memory_space<vmem>>, %arg5: memref<1x32xf32, #tpu.memory_space<vmem>>, %arg6: memref<1x1x32xf32, #tpu.memory_space<vmem>>, %arg7: memref<1x1x32xf32, #tpu.memory_space<vmem>>) attributes {dimension_semantics = [#tpu.dimension_semantics<parallel>, #tpu.dimension_semantics<arbitrary>], iteration_bounds = array<i64: 2, 1>, scalar_prefetch = 0 : i64, scratch_operands = 1 : i64, tpu.core_type = #tpu.core_type<tc>, window_params = [{transform_indices = @transform_0, window_bounds = array<i64: 1, 1, 32>}, {transform_indices = @transform_1, window_bounds = array<i64: 1, 16, 32>}, {pipeline_mode = #tpu.pipeline_mode<synchronous>, transform_indices = @transform_2, window_bounds = array<i64: 32, 32>}, {pipeline_mode = #tpu.pipeline_mode<synchronous>, transform_indices = @transform_3, window_bounds = array<i64: 1, 32>}, {transform_indices = @transform_4, window_bounds = array<i64: 1, 1, 32>}]} {
    %c0_i32 = arith.constant 0 : i32
    %0 = arith.cmpi eq, %arg1, %c0_i32 : i32
    %1 = arith.extui %0 : i1 to i32
    %c0_i32_0 = arith.constant 0 : i32
    %2 = arith.cmpi ne, %1, %c0_i32_0 : i32
    scf.if %2 {
      %cst_22 = arith.constant 0.000000e+00 : f32
      %38 = vector.broadcast %cst_22 : f32 to vector<1x1x32xf32>
      %c0_23 = arith.constant 0 : index
      %c0_24 = arith.constant 0 : index
      %c0_25 = arith.constant 0 : index
      %39 = vector.load %arg7[%c0_23, %c0_24, %c0_25] : memref<1x1x32xf32, #tpu.memory_space<vmem>>, vector<1x1x32xf32>
      tpu.vector_store %arg7[%c0_23, %c0_24, %c0_25], %38 {strides = array<i32>} : memref<1x1x32xf32, #tpu.memory_space<vmem>>, vector<1x1x32xf32>,
    } else {
    }
    %c0 = arith.constant 0 : index
    %c0_1 = arith.constant 0 : index
    %c0_2 = arith.constant 0 : index
    %3 = vector.load %arg3[%c0, %c0_1, %c0_2] : memref<1x16x32xbf16, #tpu.memory_space<vmem>>, vector<1x16x32xbf16>
    %4 = vector.shape_cast %3 : vector<1x16x32xbf16> to vector<16x32xbf16>
    %c0_3 = arith.constant 0 : index
    %c0_4 = arith.constant 0 : index
    %5 = vector.load %arg4[%c0_3, %c0_4] : memref<32x32xbf16, #tpu.memory_space<vmem>>, vector<32x32xbf16>
    %cst = arith.constant dense<0.000000e+00> : vector<16x32xf32>
    %6 = tpu.matmul %4, %5, %cst {dimension_numbers = #tpu.dot_dimension_numbers<[1], [0], [0], [1], [0, 0, 1, 1], [], []>} : vector<16x32xbf16>, vector<32x32xbf16>, vector<16x32xf32> -> vector<16x32xf32>
    %7 = vector.shape_cast %6 : vector<16x32xf32> to vector<1x16x32xf32>
    %c0_5 = arith.constant 0 : index
    %c0_6 = arith.constant 0 : index
    %8 = vector.load %arg5[%c0_5, %c0_6] : memref<1x32xf32, #tpu.memory_space<vmem>>, vector<1x32xf32>
    %9 = vector.shape_cast %8 : vector<1x32xf32> to vector<1x1x32xf32>
    %10 = vector.broadcast %9 : vector<1x1x32xf32> to vector<1x16x32xf32>
    %11 = arith.addf %7, %10 : vector<1x16x32xf32>
    %c0_7 = arith.constant 0 : index
    %c0_8 = arith.constant 0 : index
    %c0_9 = arith.constant 0 : index
    %12 = vector.load %arg2[%c0_7, %c0_8, %c0_9] : memref<1x1x32xf32, #tpu.memory_space<vmem>>, vector<1x1x32xf32>
    %13 = vector.broadcast %12 : vector<1x1x32xf32> to vector<1x16x32xf32>
    %14 = arith.mulf %11, %13 : vector<1x16x32xf32>
    %cst_10 = arith.constant dense<0.000000e+00> : vector<1x16xf32>
    %15 = vector.multi_reduction <add>, %14, %cst_10 [2] : vector<1x16x32xf32> to vector<1x16xf32>
    %16 = vector.shape_cast %15 : vector<1x16xf32> to vector<1x16x1xf32>
    %c16_i32 = arith.constant 16 : i32
    %17 = arith.muli %arg1, %c16_i32 : i32
    %18 = tpu.iota {dimensions = array<i32: 1>} : vector<1x16x1xi32>
    %19 = vector.broadcast %17 : i32 to vector<1x16x1xi32>
    %20 = arith.addi %19, %18 : vector<1x16x1xi32>
    %c0_i32_11 = arith.constant 0 : i32
    %21 = vector.broadcast %c0_i32_11 : i32 to vector<1x16x1xi32>
    %22 = arith.cmpi eq, %20, %21 : vector<1x16x1xi32>
    %c9_i32 = arith.constant 9 : i32
    %23 = vector.broadcast %c9_i32 : i32 to vector<1x16x1xi32>
    %24 = arith.cmpi sge, %20, %23 : vector<1x16x1xi32>
    %25 = arith.ori %22, %24 : vector<1x16x1xi1>
    %cst_12 = arith.constant 0.000000e+00 : f32
    %26 = vector.broadcast %cst_12 : f32 to vector<1x16x1xf32>
    %27 = arith.select %25, %26, %16 : vector<1x16x1xi1>, vector<1x16x1xf32>
    %c0_13 = arith.constant 0 : index
    %c0_14 = arith.constant 0 : index
    %c0_15 = arith.constant 0 : index
    %28 = vector.load %arg7[%c0_13, %c0_14, %c0_15] : memref<1x1x32xf32, #tpu.memory_space<vmem>>, vector<1x1x32xf32>
    %29 = vector.broadcast %27 : vector<1x16x1xf32> to vector<1x16x32xf32>
    %30 = arith.mulf %29, %11 : vector<1x16x32xf32>
    %cst_16 = arith.constant dense<0.000000e+00> : vector<1x32xf32>
    %31 = vector.multi_reduction <add>, %30, %cst_16 [1] : vector<1x16x32xf32> to vector<1x32xf32>
    %32 = vector.shape_cast %31 : vector<1x32xf32> to vector<1x1x32xf32>
    %33 = arith.addf %28, %32 : vector<1x1x32xf32>
    %c0_17 = arith.constant 0 : index
    %c0_18 = arith.constant 0 : index
    %c0_19 = arith.constant 0 : index
    %34 = vector.load %arg7[%c0_17, %c0_18, %c0_19] : memref<1x1x32xf32, #tpu.memory_space<vmem>>, vector<1x1x32xf32>
    tpu.vector_store %arg7[%c0_17, %c0_18, %c0_19], %33 {strides = array<i32>} : memref<1x1x32xf32, #tpu.memory_space<vmem>>, vector<1x1x32xf32>,
    %c0_i32_20 = arith.constant 0 : i32
    %35 = arith.cmpi eq, %arg1, %c0_i32_20 : i32
    %36 = arith.extui %35 : i1 to i32
    %c0_i32_21 = arith.constant 0 : i32
    %37 = arith.cmpi ne, %36, %c0_i32_21 : i32
    scf.if %37 {
      %c0_22 = arith.constant 0 : index
      %c0_23 = arith.constant 0 : index
      %c0_24 = arith.constant 0 : index
      %38 = vector.load %arg7[%c0_22, %c0_23, %c0_24] : memref<1x1x32xf32, #tpu.memory_space<vmem>>, vector<1x1x32xf32>
      %39 = arith.addf %12, %38 : vector<1x1x32xf32>
      %c0_25 = arith.constant 0 : index
      %c0_26 = arith.constant 0 : index
      %c0_27 = arith.constant 0 : index
      %40 = vector.load %arg6[%c0_25, %c0_26, %c0_27] : memref<1x1x32xf32, #tpu.memory_space<vmem>>, vector<1x1x32xf32>
      tpu.vector_store %arg6[%c0_25, %c0_26, %c0_27], %39 {strides = array<i32>} : memref<1x1x32xf32, #tpu.memory_space<vmem>>, vector<1x1x32xf32>,
    } else {
    }
    return
  }
  func.func @transform_0(%arg0: i32, %arg1: i32) -> (i32, i32, i32) {
    %c0_i32 = arith.constant 0 : i32
    %c0_i32_0 = arith.constant 0 : i32
    %c0_i32_1 = arith.constant 0 : i32
    return %arg0, %c0_i32, %c0_i32_0 : i32, i32, i32
  }
  func.func @transform_1(%arg0: i32, %arg1: i32) -> (i32, i32, i32) {
    %c0_i32 = arith.constant 0 : i32
    %c0_i32_0 = arith.constant 0 : i32
    return %arg0, %arg1, %c0_i32 : i32, i32, i32
  }
  func.func @transform_2(%arg0: i32, %arg1: i32) -> (i32, i32) {
    %c0_i32 = arith.constant 0 : i32
    %c0_i32_0 = arith.constant 0 : i32
    %c0_i32_1 = arith.constant 0 : i32
    return %c0_i32, %c0_i32_0 : i32, i32
  }
  func.func @transform_3(%arg0: i32, %arg1: i32) -> (i32, i32) {
    %c0_i32 = arith.constant 0 : i32
    %c0_i32_0 = arith.constant 0 : i32
    %c0_i32_1 = arith.constant 0 : i32
    return %c0_i32, %c0_i32_0 : i32, i32
  }
  func.func @transform_4(%arg0: i32, %arg1: i32) -> (i32, i32, i32) {
    %c0_i32 = arith.constant 0 : i32
    %c0_i32_0 = arith.constant 0 : i32
    %c0_i32_1 = arith.constant 0 : i32
    return %arg0, %c0_i32, %c0_i32_0 : i32, i32, i32
  }
}

</mosaic_0001>

<bundles_post_ra>
// kernel: tpu_custom_call.1
= control target key start
LH: loop header
LB: loop body
LE: loop exit
PB: predicated region body
PF: predicated region fallthrough
CT: control target
= control target key end

     0   :  { %s1005_s0 = inlined_call_operand.hbm [shape: f32[2,1,32], index: 0, kind: input, shape index: {}]   ;;  %s1006_s1 = inlined_call_operand.hbm [shape: bf16[2,16,32], index: 1, kind: input, shape index: {}]   ;;  %s1007_s2 = inlined_call_operand.hbm [shape: bf16[32,32], index: 2, kind: input, shape index: {}]   ;;  %s1008_s3 = inlined_call_operand.vmem [shape: f32[1,32], index: 3, kind: input, shape index: {}]   ;;  %s1009_s4 = inlined_call_operand.hbm [shape: f32[2,1,32], index: 4, kind: output, shape index: {}]  }
   0x1   :  { %1013 = sst [smem:[#allocation16_spill]] %s1005_s0 }
   0x2   :  { %1014 = sst [smem:[#allocation17_spill]] %s1007_s2 }
   0x3   :  { %9 = vsyncpa [#allocation4], 0 }
   0x4   :  { %11 = vsyncpa [#allocation4 + $0x1], 0 }
   0x5   :  { %12 = vsyncpa [#allocation7], 0 }
   0x6   :  { %14 = vsyncpa [#allocation7 + $0x1], 0 }
   0x7   :  { %15 = vsyncpa [#allocation5], 0 }
   0x8   :  { %17 = vsyncpa [#allocation5 + $0x1], 0  ;;  %s829_s15 = smov 0   ;;  %s831_s16 = smov 0  }
   0x9   :  { %s833_s17 = smov 0   ;;  %s835_s18 = smov 0  }
   0xa   :  { %s837_s19 = smov 0   ;;  %s839_s20 = smov 0  }
   0xb LB: > { %s860_s21 = sadd.s32 4294967295, %s798_s20   ;;  %p507_p0 = scmp.ge.s32.totalorder %s798_s20, 1  ;;  %s798_s20 = sphi %s839_s20, %s23_s20   ;;  %s794_s19 = sphi %s837_s19, %s1032_s19   ;;  %s790_s18 = sphi %s835_s18, %s1031_s18   ;;  %s786_s17 = sphi %s833_s17, %s1030_s17   ;;  %s782_s16 = sphi %s831_s16, %s1029_s16   ;;  %s778_s15 = sphi %s829_s15, %s1028_s15  }
   0xc   : > { %p56_p1 = scmp.eq.s32.totalorder %s860_s21, 0  ;;  %p162_p2 = scmp.lt.s32.totalorder %s798_s20, 3 }
   0xd   : > { %s1015_s2 = sld [smem:[#allocation17_spill]]  ;;  %s800_s26 = smov [#allocation8]  }
   0xe   : > { %p868_p3 = pnand %p507_p0, %p162_p2  ;;  %s175_s27 = sshll.u32 %s800_s26, 4  ;;  %s176_s27 = int_to_ptr.vmem [resolvable:$true] %s175_s27 }
   0xf   : > { %p509_p6 = scmp.ge.s32.totalorder %s798_s20, 2  ;;  %s1010_s28 = smov 64  }
  0x10   : > { %p545_p4 = pneg %p868_p3  ;;  %s1011_s29 = smov 4  }
  0x11   : > { %s506_s30 = sadd.s32 4294967294, %s798_s20   ;;  %s35_s5 = sadd.s32 1, %s794_s19 }
  0x12   : > { %p546_p5 = pnand %p545_p4, %p56_p1  ;;  %s42_s6 = sadd.s32 1, %s786_s17 }
  0x13   : > { %s173_s24 = sshll.u32 %s1015_s2, 4  ;;  %p37_p7 = scmp.ge.s32.totalorder %s35_s5, 2  ;;  %s174_s24 = int_to_ptr.hbm [resolvable:$true] %s173_s24 }
  0x14   : > { %548 = dma.hbm_to_vmem [thread:$0]  (!%p546_p5), %s174_s24, 256, %s176_s27, [#allocation7], %s1010_s28, %s1010_s28, %s1011_s29  }
  0x15   : > { %p49_p8 = scmp.ne.s32.totalorder %s786_s17, %s782_s16  ;;  %p50_p9 = scmp.eq.s32.totalorder %s798_s20, 0 }
  0x16   : > { %p55_p10 = scmp.ne.s32.totalorder %s782_s16, %s778_s15  ;;  %s1034_s5 = smov (%p37_p7, %s35_s5), 0 }
  0x17   : > { %1017 = sst [smem:[#allocation14_spill]] %s1034_s5  ;;  %p890_p11 = por %p50_p9, %p49_p8 }
  0x18   : > { %p896_p12 = por %p56_p1, %p55_p10  ;;  %s39_s9 = ssub.s32 %s794_s19, %s1034_s5 }
  0x19   : > { %p149_p13 = scmp.eq.s32.totalorder %s860_s21, 1  ;;  %p40_p0 = scmp.eq.s32.totalorder %s39_s9, 0 }
  0x1a   : > { %p155_p2 = scmp.eq.s32.totalorder %s506_s30, 1  ;;  %p561_p5 = scmp.lt.s32.totalorder %s798_s20, 2 }
  0x1b   : > { %p903_p4 = por %p149_p13, %p49_p8  ;;  %s192_s13 = sand.u32 1, %s786_s17  }
  0x1c   : > { %s909_s11 = scalar_select %p40_p0, %s786_s17, %s42_s6  }
  0x1d   : > { %p911_p7 = por %p155_p2, %p55_p10  ;;  %s1023_s0 = sld [smem:[#allocation16_spill]] }
  0x1e   : > { %1021 = sst [smem:[#allocation15_spill]] %s909_s11  ;;  %s195_s24 = scalar_lea.vmem [#allocation3], %s192_s13 }
  0x1f   : > { %s202_s26 = sshll.u32 %s195_s24, 4  ;;  %p550_p8 = pnand %p561_p5, %p890_p11  ;;  %s203_s26 = int_to_ptr.vmem [resolvable:$true] %s202_s26 }
  0x20   : > { %s510_s30 = sshll.u32 %s192_s13, 3  ;;  %s531_s6 = sshll.u32 %s794_s19, 3 }
  0x21   : > { %s193_s9 = scalar_lea.sflag [#allocation4], %s192_s13  ;;  %s213_s28 = scalar_lea.vmem [#allocation6], %s510_s30 }
  0x22   : > { %s223_s29 = sshll.u32 %s213_s28, 4  ;;  %s209_s2 = sand.u32 1, %s798_s20   ;;  %s224_s29 = int_to_ptr.vmem [resolvable:$true] %s223_s29 }
  0x23   : > { %s198_s23 = scalar_lea.hbm %s1023_s0, %s794_s19  ;;  %s220_s14 = scalar_lea.hbm %s1006_s1, %s531_s6 }
  0x24   : > { %s200_s27 = sshll.u32 %s198_s23, 4  ;;  %s221_s22 = sshll.u32 %s220_s14, 4  ;;  %s201_s27 = int_to_ptr.hbm [resolvable:$true] %s200_s27  ;;  %s222_s22 = int_to_ptr.hbm [resolvable:$true] %s221_s22 }
  0x25   : > { %552 = dma.hbm_to_vmem [thread:$0]  (!%p550_p8), %s201_s27, 16, %s203_s26, %s193_s9  }
  0x26   : > { %s210_s24 = scalar_lea.sflag [#allocation7], %s209_s2  ;;  %s1024_s23 = smov 4  }
  0x27   : > { %s1025_s0 = smov 64   ;;  %235 = sbr.rel (%p868_p3) target bundleno = 346 (0x15a), region = 36 }
  0x28   : > { %555 = dma.hbm_to_vmem [thread:$0]  (!%p550_p8), %s222_s22, 128, %s224_s29, %s210_s24, %s1025_s0, %s1025_s0, %s1024_s23  }
  0x29   : > { %s933_s7 = sand.u32 (!%p868_p3), 1, %s782_s16  }
  0x2a   : > { %s238_s28 = scalar_lea.sflag (!%p868_p3), [#allocation4], %s933_s7  ;;  %s240_s13 = scalar_lea.vmem (!%p868_p3), [#allocation3], %s933_s7 }
  0x2c   : > { %761 = dma.done.wait (%p896_p12), %s238_s28, 16  }
  0x2d   : > { %763 = vsyncadd (%p896_p12), %s238_s28, 4294967280  ;;  %s246_s0 = sand.u32 1, %s860_s21   ;;  %s514_s2 = sshll.u32 %s933_s7, 3 }
  0x2e   : > { %s247_s25 = scalar_lea.sflag [#allocation7], %s246_s0  ;;  %s250_s29 = scalar_lea.vmem [#allocation6], %s514_s2 }
  0x2f   : > { %765 = dma.done.wait (%p896_p12), %s247_s25, 128  }
  0x30   : > { %767 = vsyncadd (%p896_p12), %s247_s25, 4294967168 }
  0x31   : > { %769 = dma.done.wait (%p56_p1), [#allocation7], 256  }
  0x32   : > { %771 = vsyncadd (%p56_p1), [#allocation7], 4294967040  ;;  %v534_v0 = vld [vmem:[#allocation8 + $0x8] sm:$0xff]  ;;  %v533_v1 = vld [vmem:[#allocation8] sm:$0xff]  ;;  %vm315_vm0 = vcmask 261120   ;;  %vm290_vm1 = vcmask 253952   ;;  %v352_v14 = vlaneseq  ;;  %s396_s26 = scalar_lea.hbm %s1009_s4, %s790_s18 }
  0x33   : > { %325 = vmatpush.bf16.msra.mxu0 %v534_v0  ;;  %v532_v2 = vld [vmem:[%s250_s29] sm:$0xff]  ;;  %v616_v3 = vld [vmem:[%s1008_s3] ss:$0 sm:$0xff]  ;;  %v803_v13 = vmov 0.0   ;;  %s283_s27 = scalar_lea.vmem [#allocation9], %s933_s7  ;;  %s400_s6 = sshll.u32 %s396_s26, 4  ;;  %s401_s6 = int_to_ptr.hbm [resolvable:$true] %s400_s6 }
  0x34   : > { %v617_v4 = vld [vmem:[%s240_s13] ss:$0 sm:$0xff]  ;;  %291 = vst.msk [vmem:[#allocation2] sm:$0x1] %vm290_vm1, %v803_v13  ;;  %v353_v15 = vshrl.u32 %v352_v14, 7  ;;  %s398_s30 = sshll.u32 %s283_s27, 4  ;;  %s399_s30 = int_to_ptr.vmem [resolvable:$true] %s398_s30 }
  0x35   : > { %v339_v34 = vld [vmem:[%s240_s13] sm:$0x1]  ;;  %s388_s9 = scalar_lea.sflag [#allocation5], %s933_s7  ;;  %s722_s14 = sshra.s32 %s401_s6, 4  ;;  %s723_s14 = int_to_ptr.hbm [resolvable:$true] %s722_s14 }
  0x36   : > { %vm358_vm2 = vcmp.eq.s32.totalorder %v353_v15, 0  ;;  %v354_v17 = vadd.s32 8, %v353_v15  ;;  %s724_s22 = scalar_lea.hbm %s723_s14, 1  ;;  %s728_s23 = scalar_lea.hbm %s1009_s4, 2 }
  0x37   : > { %326 = vmatpush.bf16.msra.mxu0 %v533_v1  ;;  %p725_p1 = scmp.ne.s32.totalorder %s723_s14, %s724_s22  ;;  %p729_p10 = scmp.lt.s32.totalorder %s723_s14, %s1009_s4 }
  0x38   : > { %vm361_vm3 = vcmp.ge.s32.totalorder %v354_v17, 9  ;;  %p730_p11 = scmp.lt.s32.totalorder %s728_s23, %s724_s22 }
  0x39   : > { %p726_p3 = pnand %p725_p1, %p903_p4 }
  0x3a   : > { %528 = vmatmul.msk.bf16.vlgmr.msra.gmra.mxu0 %vm315_vm0, %v532_v2  ;;  %p731_p12 = por %p730_p11, %p729_p10 }
  0x3b   : > { %v366_v31 = vld [vmem:[#allocation2] sm:$0x1]  ;;  %p727_p9 = pneg %p726_p3 }
  0x3d   : > { %p732_p13 = pnand %p731_p12, %p727_p9 }
  0xb7   : > { %v328_v5 = vpop.f32.mrf.mxu0 }
  0xb8   : > { %v337_v6 = vadd.f32 %v616_v3, %v328_v5 }
  0xba   : > { %v343_v7 = vmul.f32 %v617_v4, %v337_v6 }
  0xbc   : > { %v345_v8 = vsel %vm315_vm0, %v343_v7, 0.0 }
  0xbd   : > { %346 = vadd.xlane.f32.xlu0 %v345_v8 }
  0xbf   : > { %v330_v9 = vpop.f32.mrf.mxu0 }
  0xc0   : > { %v338_v10 = vadd.f32 %v616_v3, %v330_v9 }
  0xc2   : > { %v344_v11 = vmul.f32 %v617_v4, %v338_v10 }
  0xc4   : > { %v348_v12 = vsel %vm315_vm0, %v344_v11, 0.0 }
  0xc5   : > { %349 = vadd.xlane.f32.xlu0 %v348_v12 }
 0x130   : > { %v347_v16 = vpop.xlane.xlu0 %346 }
 0x131   : > { %v364_v18 = vsel %vm358_vm2, 0.0, %v347_v16 }
 0x132   : > { %v367_v19 = vmul.f32 %v364_v18, %v337_v6 }
 0x134   : > { %v369_v23 = vsel %vm315_vm0, %v367_v19, 0.0 }
 0x138   : > { %v350_v20 = vpop.xlane.xlu0 %349 }
 0x139   : > { %v365_v21 = vsel %vm361_vm3, 0.0, %v350_v20 }
 0x13a   : > { %v368_v22 = vmul.f32 %v365_v21, %v338_v10 }
 0x13c   : > { %v370_v24 = vsel %vm315_vm0, %v368_v22, 0.0 }
 0x13d   : > { %v371_v25 = vadd.f32 %v370_v24, %v369_v23 }
 0x13f   : > { %v372_v26 = vrot.slane %v371_v25, 4 }
 0x141   : > { %v373_v27 = vadd.f32 %v372_v26, %v371_v25 }
 0x143   : > { %v374_v28 = vrot.slane %v373_v27, 2 }
 0x145   : > { %v375_v29 = vadd.f32 %v374_v28, %v373_v27 }
 0x147   : > { %v376_v30 = vrot.slane %v375_v29, 1 }
 0x149   : > { %v377_v32 = vadd.f32 %v376_v30, %v375_v29 }
 0x14b   : > { %v378_v33 = vadd.f32 %v377_v32, %v366_v31 }
 0x14d   : > { %380 = vst.msk [vmem:[#allocation2] sm:$0x1] %vm290_vm1, %v378_v33 }
 0x154   : > { %v384_v35 = vld [vmem:[#allocation2] sm:$0x1] }
 0x155   : > { %v385_v36 = vadd.f32 %v384_v35, %v339_v34 }
 0x157   : > { %386 = vst.msk [vmem:[%s283_s27] sm:$0x1] %vm290_vm1, %v385_v36 }
 0x158   : > { %735 = shalt.err (!%p732_p13)
}
 0x159   : > { %543 = dma.vmem_to_hbm [thread:$0]  (%p903_p4), %s399_s30, 16, %s401_s6, %s388_s9  }
 0x15a PF: > { %s412_s7 = sand.u32 1, %s778_s15   ;;  %p557_p0 = pnand %p509_p6, %p911_p7 }
 0x15b   : > { %s413_s0 = scalar_lea.sflag [#allocation5], %s412_s7 }
 0x15c   : > { %p558_p2 = pneg %p557_p0 }
 0x15e   : > { %773 = dma.done.wait (%p558_p2), %s413_s0, 16  }
 0x15f   : > { %775 = vsyncadd (%p558_p2), %s413_s0, 4294967280  ;;  %s23_s20 = sadd.s32 1, %s798_s20   ;;  %s1026_s2 = sld [smem:[#allocation15_spill]] }
 0x160   : > { %p20_p5 = scmp.ge.s32.totalorder %s23_s20, 4   ;;  %s1027_s10 = sld [smem:[#allocation14_spill]] }
 0x161   : > { %s1028_s15 = smov %s782_s16  ;;  %s1029_s16 = smov %s786_s17 }
 0x162   : > { %s1031_s18 = smov %s794_s19  ;;  %22 = sbr.rel (!%p20_p5) target bundleno = 11 (0xb), region = 106 }
 0x165   : > { %s1030_s17 = smov %s1026_s2 }
 0x166   : > { %s1032_s19 = smov %s1027_s10 }
 0x167   :  { %418 = vsyncpa [#allocation4], 1 }
 0x168   :  { %420 = vsyncpa [#allocation4 + $0x1], 1 }
 0x169   :  { %421 = vsyncpa [#allocation7], 1 }
 0x16a   :  { %423 = vsyncpa [#allocation7 + $0x1], 1 }
 0x16b   :  { %424 = vsyncpa [#allocation5], 1 }
 0x16c   :  { %426 = vsyncpa [#allocation5 + $0x1], 1 }

// kernel: tpu_custom_call.1
= control target key start
LH: loop header
LB: loop body
LE: loop exit
PB: predicated region body
PF: predicated region fallthrough
CT: control target
= control target key end

     0   :  { %s1005_s0 = inlined_call_operand.hbm [shape: f32[2,1,32], index: 0, kind: input, shape index: {}]   ;;  %s1006_s1 = inlined_call_operand.hbm [shape: bf16[2,16,32], index: 1, kind: input, shape index: {}]   ;;  %s1007_s2 = inlined_call_operand.hbm [shape: bf16[32,32], index: 2, kind: input, shape index: {}]   ;;  %s1008_s3 = inlined_call_operand.vmem [shape: f32[1,32], index: 3, kind: input, shape index: {}]   ;;  %s1009_s4 = inlined_call_operand.hbm [shape: f32[2,1,32], index: 4, kind: output, shape index: {}]  }
   0x1   :  { %1013 = sst [smem:[#allocation16_spill]] %s1005_s0 }
   0x2   :  { %1014 = sst [smem:[#allocation17_spill]] %s1007_s2 }
   0x3   :  { %9 = vsyncpa [#allocation4], 0 }
   0x4   :  { %11 = vsyncpa [#allocation4 + $0x1], 0 }
   0x5   :  { %12 = vsyncpa [#allocation7], 0 }
   0x6   :  { %14 = vsyncpa [#allocation7 + $0x1], 0 }
   0x7   :  { %15 = vsyncpa [#allocation5], 0 }
   0x8   :  { %17 = vsyncpa [#allocation5 + $0x1], 0  ;;  %s829_s15 = smov 0   ;;  %s831_s16 = smov 0  }
   0x9   :  { %s833_s17 = smov 0   ;;  %s835_s18 = smov 0  }
   0xa   :  { %s837_s19 = smov 0   ;;  %s839_s20 = smov 0  }
   0xb LB: > { %s860_s21 = sadd.s32 4294967295, %s798_s20   ;;  %p507_p0 = scmp.ge.s32.totalorder %s798_s20, 1  ;;  %s798_s20 = sphi %s839_s20, %s23_s20   ;;  %s794_s19 = sphi %s837_s19, %s1032_s19   ;;  %s790_s18 = sphi %s835_s18, %s1031_s18   ;;  %s786_s17 = sphi %s833_s17, %s1030_s17   ;;  %s782_s16 = sphi %s831_s16, %s1029_s16   ;;  %s778_s15 = sphi %s829_s15, %s1028_s15  }
   0xc   : > { %p56_p1 = scmp.eq.s32.totalorder %s860_s21, 0  ;;  %p162_p2 = scmp.lt.s32.totalorder %s798_s20, 3 }
   0xd   : > { %s1015_s2 = sld [smem:[#allocation17_spill]]  ;;  %s800_s26 = smov [#allocation8]  }
   0xe   : > { %p868_p3 = pnand %p507_p0, %p162_p2  ;;  %s175_s27 = sshll.u32 %s800_s26, 4  ;;  %s176_s27 = int_to_ptr.vmem [resolvable:$true] %s175_s27 }
   0xf   : > { %p509_p6 = scmp.ge.s32.totalorder %s798_s20, 2  ;;  %s1010_s28 = smov 64  }
  0x10   : > { %p545_p4 = pneg %p868_p3  ;;  %s1011_s29 = smov 4  }
  0x11   : > { %s506_s30 = sadd.s32 4294967294, %s798_s20   ;;  %s35_s5 = sadd.s32 1, %s794_s19 }
  0x12   : > { %p546_p5 = pnand %p545_p4, %p56_p1  ;;  %s42_s6 = sadd.s32 1, %s786_s17 }
  0x13   : > { %s173_s24 = sshll.u32 %s1015_s2, 4  ;;  %p37_p7 = scmp.ge.s32.totalorder %s35_s5, 2  ;;  %s174_s24 = int_to_ptr.hbm [resolvable:$true] %s173_s24 }
  0x14   : > { %548 = dma.hbm_to_vmem [thread:$0]  (!%p546_p5), %s174_s24, 256, %s176_s27, [#allocation7], %s1010_s28, %s1010_s28, %s1011_s29  }
  0x15   : > { %p49_p8 = scmp.ne.s32.totalorder %s786_s17, %s782_s16  ;;  %p50_p9 = scmp.eq.s32.totalorder %s798_s20, 0 }
  0x16   : > { %p55_p10 = scmp.ne.s32.totalorder %s782_s16, %s778_s15  ;;  %s1034_s5 = smov (%p37_p7, %s35_s5), 0 }
  0x17   : > { %1017 = sst [smem:[#allocation14_spill]] %s1034_s5  ;;  %p890_p11 = por %p50_p9, %p49_p8 }
  0x18   : > { %p896_p12 = por %p56_p1, %p55_p10  ;;  %s39_s9 = ssub.s32 %s794_s19, %s1034_s5 }
  0x19   : > { %p149_p13 = scmp.eq.s32.totalorder %s860_s21, 1  ;;  %p40_p0 = scmp.eq.s32.totalorder %s39_s9, 0 }
  0x1a   : > { %p155_p2 = scmp.eq.s32.totalorder %s506_s30, 1  ;;  %p561_p5 = scmp.lt.s32.totalorder %s798_s20, 2 }
  0x1b   : > { %p903_p4 = por %p149_p13, %p49_p8  ;;  %s192_s13 = sand.u32 1, %s786_s17  }
  0x1c   : > { %s909_s11 = scalar_select %p40_p0, %s786_s17, %s42_s6  }
  0x1d   : > { %p911_p7 = por %p155_p2, %p55_p10  ;;  %s1023_s0 = sld [smem:[#allocation16_spill]] }
  0x1e   : > { %1021 = sst [smem:[#allocation15_spill]] %s909_s11  ;;  %s195_s24 = scalar_lea.vmem [#allocation3], %s192_s13 }
  0x1f   : > { %s202_s26 = sshll.u32 %s195_s24, 4  ;;  %p550_p8 = pnand %p561_p5, %p890_p11  ;;  %s203_s26 = int_to_ptr.vmem [resolvable:$true] %s202_s26 }
  0x20   : > { %s510_s30 = sshll.u32 %s192_s13, 3  ;;  %s531_s6 = sshll.u32 %s794_s19, 3 }
  0x21   : > { %s193_s9 = scalar_lea.sflag [#allocation4], %s192_s13  ;;  %s213_s28 = scalar_lea.vmem [#allocation6], %s510_s30 }
  0x22   : > { %s223_s29 = sshll.u32 %s213_s28, 4  ;;  %s209_s2 = sand.u32 1, %s798_s20   ;;  %s224_s29 = int_to_ptr.vmem [resolvable:$true] %s223_s29 }
  0x23   : > { %s198_s23 = scalar_lea.hbm %s1023_s0, %s794_s19  ;;  %s220_s14 = scalar_lea.hbm %s1006_s1, %s531_s6 }
  0x24   : > { %s200_s27 = sshll.u32 %s198_s23, 4  ;;  %s221_s22 = sshll.u32 %s220_s14, 4  ;;  %s201_s27 = int_to_ptr.hbm [resolvable:$true] %s200_s27  ;;  %s222_s22 = int_to_ptr.hbm [resolvable:$true] %s221_s22 }
  0x25   : > { %552 = dma.hbm_to_vmem [thread:$0]  (!%p550_p8), %s201_s27, 16, %s203_s26, %s193_s9  }
  0x26   : > { %s210_s24 = scalar_lea.sflag [#allocation7], %s209_s2  ;;  %s1024_s23 = smov 4  }
  0x27   : > { %s1025_s0 = smov 64   ;;  %235 = sbr.rel (%p868_p3) target bundleno = 346 (0x15a), region = 36 }
  0x28   : > { %555 = dma.hbm_to_vmem [thread:$0]  (!%p550_p8), %s222_s22, 128, %s224_s29, %s210_s24, %s1025_s0, %s1025_s0, %s1024_s23  }
  0x29   : > { %s933_s7 = sand.u32 (!%p868_p3), 1, %s782_s16  }
  0x2a   : > { %s238_s28 = scalar_lea.sflag (!%p868_p3), [#allocation4], %s933_s7  ;;  %s240_s13 = scalar_lea.vmem (!%p868_p3), [#allocation3], %s933_s7 }
  0x2c   : > { %761 = dma.done.wait (%p896_p12), %s238_s28, 16  }
  0x2d   : > { %763 = vsyncadd (%p896_p12), %s238_s28, 4294967280  ;;  %s246_s0 = sand.u32 1, %s860_s21   ;;  %s514_s2 = sshll.u32 %s933_s7, 3 }
  0x2e   : > { %s247_s25 = scalar_lea.sflag [#allocation7], %s246_s0  ;;  %s250_s29 = scalar_lea.vmem [#allocation6], %s514_s2 }
  0x2f   : > { %765 = dma.done.wait (%p896_p12), %s247_s25, 128  }
  0x30   : > { %767 = vsyncadd (%p896_p12), %s247_s25, 4294967168 }
  0x31   : > { %769 = dma.done.wait (%p56_p1), [#allocation7], 256  }
  0x32   : > { %771 = vsyncadd (%p56_p1), [#allocation7], 4294967040  ;;  %v534_v0 = vld [vmem:[#allocation8 + $0x8] sm:$0xff]  ;;  %v533_v1 = vld [vmem:[#allocation8] sm:$0xff]  ;;  %vm315_vm0 = vcmask 261120   ;;  %vm290_vm1 = vcmask 253952   ;;  %v352_v14 = vlaneseq  ;;  %s396_s26 = scalar_lea.hbm %s1009_s4, %s790_s18 }
  0x33   : > { %325 = vmatpush.bf16.msra.mxu0 %v534_v0  ;;  %v532_v2 = vld [vmem:[%s250_s29] sm:$0xff]  ;;  %v616_v3 = vld [vmem:[%s1008_s3] ss:$0 sm:$0xff]  ;;  %v803_v13 = vmov 0.0   ;;  %s283_s27 = scalar_lea.vmem [#allocation9], %s933_s7  ;;  %s400_s6 = sshll.u32 %s396_s26, 4  ;;  %s401_s6 = int_to_ptr.hbm [resolvable:$true] %s400_s6 }
  0x34   : > { %v617_v4 = vld [vmem:[%s240_s13] ss:$0 sm:$0xff]  ;;  %291 = vst.msk [vmem:[#allocation2] sm:$0x1] %vm290_vm1, %v803_v13  ;;  %v353_v15 = vshrl.u32 %v352_v14, 7  ;;  %s398_s30 = sshll.u32 %s283_s27, 4  ;;  %s399_s30 = int_to_ptr.vmem [resolvable:$true] %s398_s30 }
  0x35   : > { %v339_v34 = vld [vmem:[%s240_s13] sm:$0x1]  ;;  %s388_s9 = scalar_lea.sflag [#allocation5], %s933_s7  ;;  %s722_s14 = sshra.s32 %s401_s6, 4  ;;  %s723_s14 = int_to_ptr.hbm [resolvable:$true] %s722_s14 }
  0x36   : > { %vm358_vm2 = vcmp.eq.s32.totalorder %v353_v15, 0  ;;  %v354_v17 = vadd.s32 8, %v353_v15  ;;  %s724_s22 = scalar_lea.hbm %s723_s14, 1  ;;  %s728_s23 = scalar_lea.hbm %s1009_s4, 2 }
  0x37   : > { %326 = vmatpush.bf16.msra.mxu0 %v533_v1  ;;  %p725_p1 = scmp.ne.s32.totalorder %s723_s14, %s724_s22  ;;  %p729_p10 = scmp.lt.s32.totalorder %s723_s14, %s1009_s4 }
  0x38   : > { %vm361_vm3 = vcmp.ge.s32.totalorder %v354_v17, 9  ;;  %p730_p11 = scmp.lt.s32.totalorder %s728_s23, %s724_s22 }
  0x39   : > { %p726_p3 = pnand %p725_p1, %p903_p4 }
  0x3a   : > { %528 = vmatmul.msk.bf16.vlgmr.msra.gmra.mxu0 %vm315_vm0, %v532_v2  ;;  %p731_p12 = por %p730_p11, %p729_p10 }
  0x3b   : > { %v366_v31 = vld [vmem:[#allocation2] sm:$0x1]  ;;  %p727_p9 = pneg %p726_p3 }
  0x3d   : > { %p732_p13 = pnand %p731_p12, %p727_p9 }
  0xb7   : > { %v328_v5 = vpop.f32.mrf.mxu0 }
  0xb8   : > { %v337_v6 = vadd.f32 %v616_v3, %v328_v5 }
  0xba   : > { %v343_v7 = vmul.f32 %v617_v4, %v337_v6 }
  0xbc   : > { %v345_v8 = vsel %vm315_vm0, %v343_v7, 0.0 }
  0xbd   : > { %346 = vadd.xlane.f32.xlu0 %v345_v8 }
  0xbf   : > { %v330_v9 = vpop.f32.mrf.mxu0 }
  0xc0   : > { %v338_v10 = vadd.f32 %v616_v3, %v330_v9 }
  0xc2   : > { %v344_v11 = vmul.f32 %v617_v4, %v338_v10 }
  0xc4   : > { %v348_v12 = vsel %vm315_vm0, %v344_v11, 0.0 }
  0xc5   : > { %349 = vadd.xlane.f32.xlu0 %v348_v12 }
 0x130   : > { %v347_v16 = vpop.xlane.xlu0 %346 }
 0x131   : > { %v364_v18 = vsel %vm358_vm2, 0.0, %v347_v16 }
 0x132   : > { %v367_v19 = vmul.f32 %v364_v18, %v337_v6 }
 0x134   : > { %v369_v23 = vsel %vm315_vm0, %v367_v19, 0.0 }
 0x138   : > { %v350_v20 = vpop.xlane.xlu0 %349 }
 0x139   : > { %v365_v21 = vsel %vm361_vm3, 0.0, %v350_v20 }
 0x13a   : > { %v368_v22 = vmul.f32 %v365_v21, %v338_v10 }
 0x13c   : > { %v370_v24 = vsel %vm315_vm0, %v368_v22, 0.0 }
 0x13d   : > { %v371_v25 = vadd.f32 %v370_v24, %v369_v23 }
 0x13f   : > { %v372_v26 = vrot.slane %v371_v25, 4 }
 0x141   : > { %v373_v27 = vadd.f32 %v372_v26, %v371_v25 }
 0x143   : > { %v374_v28 = vrot.slane %v373_v27, 2 }
 0x145   : > { %v375_v29 = vadd.f32 %v374_v28, %v373_v27 }
 0x147   : > { %v376_v30 = vrot.slane %v375_v29, 1 }
 0x149   : > { %v377_v32 = vadd.f32 %v376_v30, %v375_v29 }
 0x14b   : > { %v378_v33 = vadd.f32 %v377_v32, %v366_v31 }
 0x14d   : > { %380 = vst.msk [vmem:[#allocation2] sm:$0x1] %vm290_vm1, %v378_v33 }
 0x154   : > { %v384_v35 = vld [vmem:[#allocation2] sm:$0x1] }
 0x155   : > { %v385_v36 = vadd.f32 %v384_v35, %v339_v34 }
 0x157   : > { %386 = vst.msk [vmem:[%s283_s27] sm:$0x1] %vm290_vm1, %v385_v36 }
 0x158   : > { %735 = shalt.err (!%p732_p13)
}
 0x159   : > { %543 = dma.vmem_to_hbm [thread:$0]  (%p903_p4), %s399_s30, 16, %s401_s6, %s388_s9  }
 0x15a PF: > { %s412_s7 = sand.u32 1, %s778_s15   ;;  %p557_p0 = pnand %p509_p6, %p911_p7 }
 0x15b   : > { %s413_s0 = scalar_lea.sflag [#allocation5], %s412_s7 }
 0x15c   : > { %p558_p2 = pneg %p557_p0 }
 0x15e   : > { %773 = dma.done.wait (%p558_p2), %s413_s0, 16  }
 0x15f   : > { %775 = vsyncadd (%p558_p2), %s413_s0, 4294967280  ;;  %s23_s20 = sadd.s32 1, %s798_s20   ;;  %s1026_s2 = sld [smem:[#allocation15_spill]] }
 0x160   : > { %p20_p5 = scmp.ge.s32.totalorder %s23_s20, 4   ;;  %s1027_s10 = sld [smem:[#allocation14_spill]] }
 0x161   : > { %s1028_s15 = smov %s782_s16  ;;  %s1029_s16 = smov %s786_s17 }
 0x162   : > { %s1031_s18 = smov %s794_s19  ;;  %22 = sbr.rel (!%p20_p5) target bundleno = 11 (0xb), region = 106 }
 0x165   : > { %s1030_s17 = smov %s1026_s2 }
 0x166   : > { %s1032_s19 = smov %s1027_s10 }
 0x167   :  { %418 = vsyncpa [#allocation4], 1 }
 0x168   :  { %420 = vsyncpa [#allocation4 + $0x1], 1 }
 0x169   :  { %421 = vsyncpa [#allocation7], 1 }
 0x16a   :  { %423 = vsyncpa [#allocation7 + $0x1], 1 }
 0x16b   :  { %424 = vsyncpa [#allocation5], 1 }
 0x16c   :  { %426 = vsyncpa [#allocation5 + $0x1], 1 }

</bundles_post_ra>
